<compile_context>
chip_gen: v7x
topology: tpu7x:2x2x1
jax: 0.10.0
libtpu: 0.0.40
codegen_flags: <defaults>
</compile_context>

<pallas_src>
import jax
import jax.numpy as jnp
from jax.experimental import pallas as pl
from jax.experimental.pallas import tpu as pltpu


def lanet_kernel(x_ref, w1_ref, t1_ref, w2_ref, t2_ref, o_ref):
    # x_ref : (B_blk, C, TP)   channels on sublanes, pixels on lanes
    # w1_ref: (Cr, C)          conv1 weight with bn1 scale folded in
    # t1_ref: (Cr, 1)          folded conv1 bias + bn1 shift
    # w2_ref: (Cr, 1)          conv2 weight (bn2 scale folded) as a column
    # t2_ref: (1, 1)           folded conv2 bias + bn2 shift
    # o_ref : (B_blk, 1, TP)
    w1 = w1_ref[...]
    t1 = t1_ref[...]
    w2 = w2_ref[...]
    t2 = t2_ref[...]
    for b in range(x_ref.shape[0]):            # static, small (<= 8) unroll
        x = x_ref[b]                                                    # (C, TP)
        # conv1 (1x1) + folded bn1 + ReLU  -> MXU matmul, lane-dense
        h = jnp.dot(w1, x, preferred_element_type=jnp.float32)         # (Cr, TP)
        h = jnp.maximum(h + t1, 0.0)
        # conv2 (1x1 -> 1 channel) + folded bn2 + sigmoid.
        # Cr is tiny (C // ratio), so use a VPU broadcast-multiply + sublane
        # reduce instead of an M=1 MXU matmul (frees the MXU drain).
        y = jnp.sum(w2 * h, axis=0, keepdims=True)                      # (1, TP)
        o_ref[b] = jax.nn.sigmoid(y + t2)


def _round_up(a, b):
    return (a + b - 1) // b * b


def _cdiv(a, b):
    return (a + b - 1) // b


def _vmem_capacity_bytes():
    try:
        return int(pltpu.get_tpu_info().vmem_capacity_bytes)
    except Exception:
        return 64 << 20   # v7x worst case; safe lower bound on every generation


def lanet_forward(x_nchw, params, *, tile_p=None):
    """x_nchw: (N, C, H, W) float32 -> (N, 1, H, W) float32 (eval-mode BN)."""
    N, C, H, W = x_nchw.shape
    Cr = params["w1"].shape[0]  # channel_num // ratio
    eps = 1e-5

    HW = H * W
    HW128 = _round_up(HW, 128)

    # ---- generation-aware tile selection (kernel is purely HBM-read-bound) ----
    vmem_cap = _vmem_capacity_bytes()
    vmem_budget = vmem_cap // 2                         # for double-buffered x+out blocks
    max_lanes = max(128, (vmem_budget // (2 * (C + 1) * 4)) // 128 * 128)
    target_lanes = min(16384, max_lanes)

    if tile_p is not None:
        # user override: enforce the 128-lane constraint
        tile_p = min(max(128, _round_up(int(tile_p), 128)), HW128)
        b_blk = 1
    elif HW128 <= target_lanes:
        # small feature map: one pixel tile per image, several images per grid step
        tile_p = HW128
        b_blk = max(1, min(N, 8, target_lanes // HW128))
    else:
        # large feature map: split pixels into near-equal 128-aligned tiles
        n_p = _cdiv(HW128, target_lanes)
        tile_p = _round_up(_cdiv(HW128, n_p), 128)
        b_blk = 1

    grid = (_cdiv(N, b_blk), _cdiv(HW128, tile_p))

    # Native NCHW view; pad the pixel axis only to a multiple of 128
    # (no-op when already aligned — no extra HBM pass for common shapes).
    x3 = x_nchw.reshape(N, C, HW)
    if HW128 != HW:
        x3 = jnp.pad(x3, ((0, 0), (0, 0), (0, HW128 - HW)))

    # Fold conv bias + eval-mode BatchNorm into per-layer weight/shift:
    #   BN(Wx + b) = (s*W) x + ((b - mean)*s + beta)
    s1 = params["bn1_gamma"] / jnp.sqrt(params["bn1_var"] + eps)               # (Cr,)
    w1f = params["w1"].reshape(Cr, C) * s1[:, None]                            # (Cr, C)
    t1f = ((params["b1"] - params["bn1_mean"]) * s1
           + params["bn1_beta"]).reshape(Cr, 1)                                # (Cr, 1)
    s2 = params["bn2_gamma"] / jnp.sqrt(params["bn2_var"] + eps)               # (1,)
    w2f = (params["w2"].reshape(1, Cr) * s2[:, None]).reshape(Cr, 1)           # (Cr, 1)
    t2f = ((params["b2"] - params["bn2_mean"]) * s2
           + params["bn2_beta"]).reshape(1, 1)                                 # (1, 1)

    # Scoped-VMEM limit sized to actual usage (+ headroom), capped per generation
    # (v5e's 16 MiB scoped default would otherwise block large tiles).
    block_bytes = b_blk * (C + 1) * tile_p * 4
    weight_bytes = (Cr * C + 2 * Cr + 1) * 4
    vmem_need = 2 * block_bytes + 2 * weight_bytes
    vmem_limit = int(max(16 << 20, min(vmem_cap * 3 // 4, vmem_need + (8 << 20))))

    const = lambda n, p: (0, 0)   # small parameter blocks stay VMEM-resident

    out = pl.pallas_call(
        lanet_kernel,
        out_shape=jax.ShapeDtypeStruct((N, 1, HW128), jnp.float32),
        grid_spec=pltpu.PrefetchScalarGridSpec(
            num_scalar_prefetch=0,
            grid=grid,
            in_specs=[
                pl.BlockSpec((b_blk, C, tile_p), lambda n, p: (n, 0, p)),  # x tile
                pl.BlockSpec((Cr, C), const),                              # folded w1
                pl.BlockSpec((Cr, 1), const),                              # folded shift 1
                pl.BlockSpec((Cr, 1), const),                              # folded w2 column
                pl.BlockSpec((1, 1), const),                               # folded shift 2
            ],
            out_specs=pl.BlockSpec((b_blk, 1, tile_p), lambda n, p: (n, 0, p)),
        ),
        compiler_params=pltpu.CompilerParams(
            dimension_semantics=("parallel", "parallel"),
            vmem_limit_bytes=vmem_limit),
    )(x3, w1f, t1f, w2f, t2f)

    # (N, 1, HW128) -> (N, 1, H, W)
    return out[:, :, :HW].reshape(N, 1, H, W)


def init_params(key, channel_num, ratio):
    cr = channel_num // ratio
    ks = jax.random.split(key, 12)
    p = {
        "w1": jax.random.normal(ks[0], (cr, channel_num, 1, 1), jnp.float32) * 0.1,
        "b1": jax.random.normal(ks[1], (cr,), jnp.float32) * 0.1,
        "bn1_gamma": 1.0 + 0.1 * jax.random.normal(ks[2], (cr,), jnp.float32),
        "bn1_beta": 0.1 * jax.random.normal(ks[3], (cr,), jnp.float32),
        "bn1_mean": 0.1 * jax.random.normal(ks[4], (cr,), jnp.float32),
        "bn1_var": 0.5 + jnp.abs(jax.random.normal(ks[5], (cr,), jnp.float32)),
        "w2": jax.random.normal(ks[6], (1, cr, 1, 1), jnp.float32) * 0.1,
        "b2": jax.random.normal(ks[7], (1,), jnp.float32) * 0.1,
        "bn2_gamma": 1.0 + 0.1 * jax.random.normal(ks[8], (1,), jnp.float32),
        "bn2_beta": 0.1 * jax.random.normal(ks[9], (1,), jnp.float32),
        "bn2_mean": 0.1 * jax.random.normal(ks[10], (1,), jnp.float32),
        "bn2_var": 0.5 + jnp.abs(jax.random.normal(ks[11], (1,), jnp.float32)),
    }
    return p


def lanet_reference(x_nchw, params):
    """Pure-JAX reference (eval-mode BN) for sanity checking."""
    eps = 1e-5
    N, C, H, W = x_nchw.shape
    cr = params["w1"].shape[0]
    x = jnp.transpose(x_nchw, (0, 2, 3, 1))                    # NHWC
    h = jnp.einsum("nhwc,oc->nhwo", x, params["w1"].reshape(cr, C)) + params["b1"]
    h = (h - params["bn1_mean"]) / jnp.sqrt(params["bn1_var"] + eps) \
        * params["bn1_gamma"] + params["bn1_beta"]
    h = jnp.maximum(h, 0.0)
    y = jnp.einsum("nhwc,oc->nhwo", h, params["w2"].reshape(1, cr)) + params["b2"]
    y = (y - params["bn2_mean"]) / jnp.sqrt(params["bn2_var"] + eps) \
        * params["bn2_gamma"] + params["bn2_beta"]
    y = jax.nn.sigmoid(y)
    return jnp.transpose(y, (0, 3, 1, 2))                      # (N,1,H,W)


if __name__ == "__main__":
    # channel_num must be divisible by ratio=16
    N, C, H, W = 2, 64, 8, 8
    ratio = 16

    key = jax.random.PRNGKey(0)
    kx, kp = jax.random.split(key)
    x = jax.random.normal(kx, (N, C, H, W), jnp.float32)
    params = init_params(kp, C, ratio)

    out = lanet_forward(x, params)
    out = jax.block_until_ready(out)

    ref = lanet_reference(x, params)
    assert out.shape == (N, 1, H, W), out.shape
    assert jnp.allclose(out, ref, atol=1e-5, rtol=1e-5), \
        float(jnp.max(jnp.abs(out - ref)))

    print("KERNEL_OK")
</pallas_src>

<mosaic_0001>
module attributes {stable_mosaic.version = 11 : i64} {
  func.func @lanet_kernel(%arg0: i32, %arg1: i32, %arg2: memref<2x64x128xf32, #tpu.memory_space<vmem>>, %arg3: memref<4x64xf32, #tpu.memory_space<vmem>>, %arg4: memref<4x1xf32, #tpu.memory_space<vmem>>, %arg5: memref<4x1xf32, #tpu.memory_space<vmem>>, %arg6: memref<1x1xf32, #tpu.memory_space<vmem>>, %arg7: memref<2x1x128xf32, #tpu.memory_space<vmem>>) attributes {dimension_semantics = [#tpu.dimension_semantics<parallel>, #tpu.dimension_semantics<parallel>], iteration_bounds = array<i64: 1, 1>, scalar_prefetch = 0 : i64, scratch_operands = 0 : i64, tpu.core_type = #tpu.core_type<tc>, window_params = [{transform_indices = @transform_0, window_bounds = array<i64: 2, 64, 128>}, {pipeline_mode = #tpu.pipeline_mode<synchronous>, transform_indices = @transform_1, window_bounds = array<i64: 4, 64>}, {pipeline_mode = #tpu.pipeline_mode<synchronous>, transform_indices = @transform_2, window_bounds = array<i64: 4, 1>}, {pipeline_mode = #tpu.pipeline_mode<synchronous>, transform_indices = @transform_3, window_bounds = array<i64: 4, 1>}, {pipeline_mode = #tpu.pipeline_mode<synchronous>, transform_indices = @transform_4, window_bounds = array<i64: 1, 1>}, {transform_indices = @transform_5, window_bounds = array<i64: 2, 1, 128>}]} {
    %c0 = arith.constant 0 : index
    %c0_0 = arith.constant 0 : index
    %0 = vector.load %arg3[%c0, %c0_0] : memref<4x64xf32, #tpu.memory_space<vmem>>, vector<4x64xf32>
    %c0_1 = arith.constant 0 : index
    %c0_2 = arith.constant 0 : index
    %1 = vector.load %arg4[%c0_1, %c0_2] : memref<4x1xf32, #tpu.memory_space<vmem>>, vector<4x1xf32>
    %c0_3 = arith.constant 0 : index
    %c0_4 = arith.constant 0 : index
    %2 = vector.load %arg5[%c0_3, %c0_4] : memref<4x1xf32, #tpu.memory_space<vmem>>, vector<4x1xf32>
    %c0_5 = arith.constant 0 : index
    %c0_6 = arith.constant 0 : index
    %3 = vector.load %arg6[%c0_5, %c0_6] : memref<1x1xf32, #tpu.memory_space<vmem>>, vector<1x1xf32>
    %c0_7 = arith.constant 0 : index
    %c0_8 = arith.constant 0 : index
    %c0_9 = arith.constant 0 : index
    %4 = vector.load %arg2[%c0_7, %c0_8, %c0_9] : memref<2x64x128xf32, #tpu.memory_space<vmem>>, vector<1x64x128xf32>
    %5 = vector.shape_cast %4 : vector<1x64x128xf32> to vector<64x128xf32>
    %cst = arith.constant dense<0.000000e+00> : vector<4x128xf32>
    %6 = tpu.matmul %0, %5, %cst {dimension_numbers = #tpu.dot_dimension_numbers<[1], [0], [0], [1], [0, 0, 1, 1], [], []>} : vector<4x64xf32>, vector<64x128xf32>, vector<4x128xf32> -> vector<4x128xf32>
    %7 = vector.broadcast %1 : vector<4x1xf32> to vector<4x128xf32>
    %8 = arith.addf %6, %7 : vector<4x128xf32>
    %cst_10 = arith.constant 0.000000e+00 : f32
    %9 = vector.broadcast %cst_10 : f32 to vector<4x128xf32>
    %10 = arith.maximumf %8, %9 : vector<4x128xf32>
    %11 = vector.broadcast %2 : vector<4x1xf32> to vector<4x128xf32>
    %12 = arith.mulf %11, %10 : vector<4x128xf32>
    %cst_11 = arith.constant dense<0.000000e+00> : vector<128xf32>
    %13 = vector.multi_reduction <add>, %12, %cst_11 [0] : vector<4x128xf32> to vector<128xf32>
    %14 = vector.shape_cast %13 : vector<128xf32> to vector<1x128xf32>
    %15 = vector.broadcast %3 : vector<1x1xf32> to vector<1x128xf32>
    %16 = arith.addf %14, %15 : vector<1x128xf32>
    %17 = arith.negf %16 : vector<1x128xf32>
    %18 = math.exp %17 : vector<1x128xf32>
    %cst_12 = arith.constant 1.000000e+00 : f32
    %19 = vector.broadcast %cst_12 : f32 to vector<1x128xf32>
    %20 = arith.addf %19, %18 : vector<1x128xf32>
    %21 = arith.divf %19, %20 : vector<1x128xf32>
    %c0_13 = arith.constant 0 : index
    %c0_14 = arith.constant 0 : index
    %c0_15 = arith.constant 0 : index
    %22 = vector.load %arg7[%c0_13, %c0_14, %c0_15] : memref<2x1x128xf32, #tpu.memory_space<vmem>>, vector<1x1x128xf32>
    %23 = vector.shape_cast %22 : vector<1x1x128xf32> to vector<1x128xf32>
    %24 = vector.shape_cast %21 : vector<1x128xf32> to vector<1x1x128xf32>
    tpu.vector_store %arg7[%c0_13, %c0_14, %c0_15], %24 {strides = array<i32>} : memref<2x1x128xf32, #tpu.memory_space<vmem>>, vector<1x1x128xf32>,
    %c1 = arith.constant 1 : index
    %c0_16 = arith.constant 0 : index
    %c0_17 = arith.constant 0 : index
    %25 = vector.load %arg2[%c1, %c0_16, %c0_17] : memref<2x64x128xf32, #tpu.memory_space<vmem>>, vector<1x64x128xf32>
    %26 = vector.shape_cast %25 : vector<1x64x128xf32> to vector<64x128xf32>
    %cst_18 = arith.constant dense<0.000000e+00> : vector<4x128xf32>
    %27 = tpu.matmul %0, %26, %cst_18 {dimension_numbers = #tpu.dot_dimension_numbers<[1], [0], [0], [1], [0, 0, 1, 1], [], []>} : vector<4x64xf32>, vector<64x128xf32>, vector<4x128xf32> -> vector<4x128xf32>
    %28 = vector.broadcast %1 : vector<4x1xf32> to vector<4x128xf32>
    %29 = arith.addf %27, %28 : vector<4x128xf32>
    %cst_19 = arith.constant 0.000000e+00 : f32
    %30 = vector.broadcast %cst_19 : f32 to vector<4x128xf32>
    %31 = arith.maximumf %29, %30 : vector<4x128xf32>
    %32 = vector.broadcast %2 : vector<4x1xf32> to vector<4x128xf32>
    %33 = arith.mulf %32, %31 : vector<4x128xf32>
    %cst_20 = arith.constant dense<0.000000e+00> : vector<128xf32>
    %34 = vector.multi_reduction <add>, %33, %cst_20 [0] : vector<4x128xf32> to vector<128xf32>
    %35 = vector.shape_cast %34 : vector<128xf32> to vector<1x128xf32>
    %36 = vector.broadcast %3 : vector<1x1xf32> to vector<1x128xf32>
    %37 = arith.addf %35, %36 : vector<1x128xf32>
    %38 = arith.negf %37 : vector<1x128xf32>
    %39 = math.exp %38 : vector<1x128xf32>
    %cst_21 = arith.constant 1.000000e+00 : f32
    %40 = vector.broadcast %cst_21 : f32 to vector<1x128xf32>
    %41 = arith.addf %40, %39 : vector<1x128xf32>
    %42 = arith.divf %40, %41 : vector<1x128xf32>
    %c1_22 = arith.constant 1 : index
    %c0_23 = arith.constant 0 : index
    %c0_24 = arith.constant 0 : index
    %43 = vector.load %arg7[%c1_22, %c0_23, %c0_24] : memref<2x1x128xf32, #tpu.memory_space<vmem>>, vector<1x1x128xf32>
    %44 = vector.shape_cast %43 : vector<1x1x128xf32> to vector<1x128xf32>
    %45 = vector.shape_cast %42 : vector<1x128xf32> to vector<1x1x128xf32>
    tpu.vector_store %arg7[%c1_22, %c0_23, %c0_24], %45 {strides = array<i32>} : memref<2x1x128xf32, #tpu.memory_space<vmem>>, vector<1x1x128xf32>,
    return
  }
  func.func @transform_0(%arg0: i32, %arg1: i32) -> (i32, i32, i32) {
    %c0_i32 = arith.constant 0 : i32
    %c0_i32_0 = arith.constant 0 : i32
    return %arg0, %c0_i32, %arg1 : i32, i32, i32
  }
  func.func @transform_1(%arg0: i32, %arg1: i32) -> (i32, i32) {
    %c0_i32 = arith.constant 0 : i32
    %c0_i32_0 = arith.constant 0 : i32
    %c0_i32_1 = arith.constant 0 : i32
    return %c0_i32, %c0_i32_0 : i32, i32
  }
  func.func @transform_2(%arg0: i32, %arg1: i32) -> (i32, i32) {
    %c0_i32 = arith.constant 0 : i32
    %c0_i32_0 = arith.constant 0 : i32
    %c0_i32_1 = arith.constant 0 : i32
    return %c0_i32, %c0_i32_0 : i32, i32
  }
  func.func @transform_3(%arg0: i32, %arg1: i32) -> (i32, i32) {
    %c0_i32 = arith.constant 0 : i32
    %c0_i32_0 = arith.constant 0 : i32
    %c0_i32_1 = arith.constant 0 : i32
    return %c0_i32, %c0_i32_0 : i32, i32
  }
  func.func @transform_4(%arg0: i32, %arg1: i32) -> (i32, i32) {
    %c0_i32 = arith.constant 0 : i32
    %c0_i32_0 = arith.constant 0 : i32
    %c0_i32_1 = arith.constant 0 : i32
    return %c0_i32, %c0_i32_0 : i32, i32
  }
  func.func @transform_5(%arg0: i32, %arg1: i32) -> (i32, i32, i32) {
    %c0_i32 = arith.constant 0 : i32
    %c0_i32_0 = arith.constant 0 : i32
    return %arg0, %c0_i32, %arg1 : i32, i32, i32
  }
}

</mosaic_0001>

<bundles_post_ra>
// kernel: tpu_custom_call.1
= control target key start
LH: loop header
LB: loop body
LE: loop exit
PB: predicated region body
PF: predicated region fallthrough
CT: control target
= control target key end

     0   :  { %s502_s0 = inlined_call_operand.hbm [shape: f32[2,64,128], index: 0, kind: input, shape index: {}]   ;;  %s503_s1 = inlined_call_operand.vmem [shape: f32[4,64], index: 1, kind: input, shape index: {}]   ;;  %s504_s2 = inlined_call_operand.vmem [shape: f32[4,1], index: 2, kind: input, shape index: {}]   ;;  %s505_s3 = inlined_call_operand.vmem [shape: f32[4,1], index: 3, kind: input, shape index: {}]   ;;  %s506_s4 = inlined_call_operand.<no memory space> [shape: f32[1,1], index: 4, kind: input, shape index: {}]   ;;  %s507_s5 = inlined_call_operand.hbm [shape: f32[2,1,128], index: 5, kind: output, shape index: {}]  }
   0x1   :  { %v10_v0 = vstv %s506_s4 }
   0x2   :  { %11 = vst [vmem:[#allocation2] sm:$0x1] %v10_v0 }
   0x3   :  { %12 = vsyncpa [#allocation4], 0 }
   0x4   :  { %13 = vsyncpa [#allocation5], 0  ;;  %s426_s20 = smov [#allocation3]   ;;  %s378_s24 = scalar_lea.hbm %s502_s0, 2048 }
   0x5   :  { %s19_s21 = sshll.u32 %s426_s20, 4  ;;  %p379_p0 = scmp.ne.s32.totalorder %s502_s0, %s378_s24  ;;  %s20_s21 = int_to_ptr.vmem [resolvable:$true] %s19_s21 }
   0x6   :  { %p382_p1 = scmp.lt.u32.totalorder %s378_s24, %s502_s0 }
   0x8   :  { %p384_p2 = pnand %p382_p1, %p379_p0 }
   0xa   :  { %387 = shalt.err (!%p384_p2)
}
   0xb   :  { %s388_s4 = scalar_lea.vmem %s20_s21, 2048  ;;  %p393_p4 = scmp.lt.s32.totalorder %s20_s21, %s20_s21 }
   0xc   :  { %p389_p3 = scmp.ne.s32.totalorder %s20_s21, %s388_s4  ;;  %p394_p5 = scmp.lt.s32.totalorder %s388_s4, %s388_s4 }
   0xe   :  { %p395_p6 = por %p394_p5, %p393_p4 }
  0x10   :  { %p396_p7 = pnand %p395_p6, %p389_p3 }
  0x12   :  { %399 = shalt.err (!%p396_p7)
}
  0x13   :  { %s427_s29 = smov 128   ;;  %s428_s30 = smov 8  }
  0x14   :  { %25 = dma.hbm_to_vmem [thread:$0]  %s502_s0, 2048, %s20_s21, [#allocation4], %s427_s29, %s427_s29, %s428_s30  }
  0x15   :  { %422 = dma.done.wait [#allocation4], 2048  }
  0x16   :  { %423 = vsyncadd [#allocation4], 4294965248  ;;  %v429_v1 = vmov 0.0|0.0   ;;  %vm430_vm0 = vmmov 0   ;;  %v431_v2 = vmov 0.0   ;;  %v432_v3 = vmov 0  }
  0x17   :  { %334 = vmatprep.subr.bf16.mxu0 %v429_v1  ;;  %346 = vmatprep.subr.bf16.mxu1 %v429_v1  ;;  %v41_v4 = vld [vmem:[#allocation3] sm:$0xff]  ;;  %v42_v5 = vld [vmem:[#allocation3 + $0x8] sm:$0xff]  ;;  %v43_v9 = vld [vmem:[#allocation3 + $0x10] sm:$0xff]  ;;  %vm54_vm1 = vcmask 523264   ;;  %vm135_vm2 = vcmask 1043456   ;;  %v148_v42 = vlaneseq }
  0x18   :  { %312 = vmatprep.mubr.msk.f32.mxu0 %vm430_vm0, %v431_v2  ;;  %331 = vmatprep.mubr.msk.f32.mxu1 %vm430_vm0, %v431_v2  ;;  %v161_v6 = vld [vmem:[#allocation3 + $0x40] sm:$0xff]  ;;  %v335_v7 = vpack.c.bf16 %v42_v5, %v41_v4  ;;  %v162_v8 = vld [vmem:[#allocation3 + $0x48] sm:$0xff]  ;;  %v44_v10 = vld [vmem:[#allocation3 + $0x18] sm:$0xff] }
  0x19   :  { %368 = vset.pattern.permute.xlu0 %v432_v3  ;;  %369 = vset.pattern.permute.xlu1 %v432_v3  ;;  %v347_v11 = vpack.c.bf16 %v162_v8, %v161_v6  ;;  %v163_v12 = vld [vmem:[#allocation3 + $0x50] sm:$0xff]  ;;  %v164_v13 = vld [vmem:[#allocation3 + $0x58] sm:$0xff]  ;;  %v338_v14 = vpack.c.bf16 %v44_v10, %v43_v9  ;;  %v45_v16 = vld [vmem:[#allocation3 + $0x20] sm:$0xff]  ;;  %v149_v48 = vshrl.u32 %v148_v42, 7 }
  0x1a   :  { %336 = vmatpush3.bf16.msra.mxu0 %v335_v7  ;;  %v350_v15 = vpack.c.bf16 %v164_v13, %v163_v12  ;;  %v46_v17 = vld [vmem:[#allocation3 + $0x28] sm:$0xff]  ;;  %v165_v18 = vld [vmem:[#allocation3 + $0x60] sm:$0xff]  ;;  %v40_v21 = vld [vmem:[#allocation2] sm:$0x1] }
  0x1b   :  { %348 = vmatpush3.bf16.msra.mxu1 %v347_v11  ;;  %337 = vmatprep.subr.bf16.mxu0 %v429_v1  ;;  %v166_v19 = vld [vmem:[#allocation3 + $0x68] sm:$0xff]  ;;  %v38_v20 = vld [vmem:[%s504_s2] sm:$0xf]  ;;  %v341_v22 = vpack.c.bf16 %v46_v17, %v45_v16  ;;  %v47_v25 = vld [vmem:[#allocation3 + $0x30] sm:$0xff]  ;;  %v150_v53 = vsub.s32 0, %v149_v48 }
  0x1c   :  { %349 = vmatprep.subr.bf16.mxu1 %v429_v1  ;;  %51 = vperm.xlu0 %368, %v38_v20   ;;  %v39_v23 = vld [vmem:[%s505_s3] sm:$0xf]  ;;  %v353_v24 = vpack.c.bf16 %v166_v19, %v165_v18  ;;  %v167_v27 = vld [vmem:[#allocation3 + $0x70] sm:$0xff] }
  0x1d   :  { %145 = vperm.xlu1 %369, %v40_v21   ;;  %v48_v26 = vld [vmem:[#allocation3 + $0x38] sm:$0xff] }
  0x1e   :  { %339 = vmatpush3.bf16.msra.mxu0 %v338_v14  ;;  %v168_v28 = vld [vmem:[#allocation3 + $0x78] sm:$0xff]  ;;  %v344_v29 = vpack.c.bf16 %v48_v26, %v47_v25 }
  0x1f   :  { %351 = vmatpush3.bf16.msra.mxu1 %v350_v15  ;;  %340 = vmatprep.subr.bf16.mxu0 %v429_v1  ;;  %v356_v30 = vpack.c.bf16 %v168_v28, %v167_v27  ;;  %v37_v31 = vld [vmem:[%s503_s1] sm:$0xf]  ;;  %s433_s1 = smov [#allocation6]  }
  0x20   :  { %352 = vmatprep.subr.bf16.mxu1 %v429_v1  ;;  %131 = vperm.xlu0 %368, %v39_v23   ;;  %s262_s3 = sshll.u32 %s433_s1, 4  ;;  %s263_s3 = int_to_ptr.vmem [resolvable:$true] %s262_s3 }
  0x21   :  { %s400_s12 = scalar_lea.vmem %s263_s3, 32  ;;  %p405_p9 = scmp.lt.s32.totalorder %s263_s3, %s263_s3 }
  0x22   :  { %342 = vmatpush3.bf16.msra.mxu0 %v341_v22  ;;  %p401_p8 = scmp.ne.s32.totalorder %s263_s3, %s400_s12  ;;  %p406_p10 = scmp.lt.s32.totalorder %s400_s12, %s400_s12 }
  0x23   :  { %354 = vmatpush3.bf16.msra.mxu1 %v353_v24  ;;  %343 = vmatprep.subr.bf16.mxu0 %v429_v1 }
  0x24   :  { %355 = vmatprep.subr.bf16.mxu1 %v429_v1  ;;  %p407_p11 = por %p406_p10, %p405_p9 }
  0x26   :  { %345 = vmatpush3.bf16.msra.mxu0 %v344_v29  ;;  %p408_p12 = pnand %p407_p11, %p401_p8 }
  0x27   :  { %357 = vmatpush3.bf16.msra.mxu1 %v356_v30 }
  0x29   :  { %313 = vmatmul.mubr.msk.f32.vlgmr.msra.gmra.mrb[0].mxu0 %vm54_vm1, %v37_v31 }
  0x2a   :  { %332 = vmatmul.mubr.msk.f32.vlgmr.msra.gmra.mrb[0].mxu1 %vm54_vm1, %v37_v31 }
  0x9b   :  { %v52_v32 = vpop.permute.xlu0 %51 }
  0x9c   :  { %v146_v55 = vpop.permute.xlu1 %145 }
  0x9d   :  { %v151_v59 = vrot.slane %v146_v55, %v150_v53 }
  0x9f   :  { %v132_v40 = vpop.permute.xlu0 %131 }
  0xfc   :  { %v124_v33 = vpop.f32.mrb[0].mxu0 }
  0xfd   :  { %v125_v34 = vadd.f32 %v124_v33, %v52_v32  ;;  %v235_v35 = vpop.f32.mrb[0].mxu1  ;;  %v314_v36 = vpop.f32.mrb[1].mxu0 }
  0xfe   :  { %v236_v37 = vadd.f32 %v235_v35, %v52_v32  ;;  %v333_v38 = vpop.f32.mrb[1].mxu1 }
  0xff   :  { %v128_v39 = vmax.f32 %v125_v34, 0.0 }
 0x100   :  { %v239_v41 = vmax.f32 %v236_v37, 0.0 }
 0x101   :  { %v134_v43 = vmul.f32 %v132_v40, %v128_v39 }
 0x102   :  { %v240_v44 = vmul.f32 %v239_v41, %v132_v40 }
 0x103   :  { %v136_v45 = vsel %vm135_vm2, %v134_v43, 0.0 }
 0x104   :  { %v137_v46 = vrot.slane %v136_v45, 4  ;;  %v241_v47 = vsel %vm135_vm2, %v240_v44, 0.0 }
 0x105   :  { %v242_v49 = vrot.slane %v241_v47, 4 }
 0x106   :  { %v138_v50 = vadd.f32 %v137_v46, %v136_v45 }
 0x107   :  { %v243_v51 = vadd.f32 %v242_v49, %v241_v47 }
 0x108   :  { %v139_v52 = vrot.slane %v138_v50, 2 }
 0x109   :  { %v244_v54 = vrot.slane %v243_v51, 2 }
 0x10a   :  { %v140_v56 = vadd.f32 %v139_v52, %v138_v50 }
 0x10b   :  { %v245_v57 = vadd.f32 %v244_v54, %v243_v51 }
 0x10c   :  { %v141_v58 = vrot.slane %v140_v56, 1 }
 0x10d   :  { %v246_v60 = vrot.slane %v245_v57, 1 }
 0x10e   :  { %v142_v61 = vadd.f32 %v141_v58, %v140_v56 }
 0x10f   :  { %v247_v62 = vadd.f32 %v246_v60, %v245_v57 }
 0x110   :  { %v152_v63 = vadd.f32 %v151_v59, %v142_v61 }
 0x111   :  { %v248_v0 = vadd.f32 %v247_v62, %v151_v59 }
 0x112   :  { %v275_v1 = vmul.f32 -1.442695, %v152_v63 }
 0x113   :  { %v277_v2 = vmul.f32 -1.442695, %v248_v0 }
 0x114   :  { %370 = vpow2.f32 %v275_v1 }
 0x115   :  { %372 = vpow2.f32 %v277_v2 }
 0x11e   :  { %v371_v3 = vpop.eup %370 }
 0x11f   :  { %v373_v4 = vpop.eup %372  ;;  %v156_v5 = vadd.f32 1.0, %v371_v3 }
 0x120   :  { %v252_v6 = vadd.f32 1.0, %v373_v4 }
 0x121   :  { %374 = vrcp.f32 %v156_v5 }
 0x122   :  { %376 = vrcp.f32 %v252_v6 }
 0x12b   :  { %v375_v7 = vpop.eup %374 }
 0x12c   :  { %v377_v8 = vpop.eup %376  ;;  %159 = vst [vmem:[#allocation6] sm:$0x1] %v375_v7 }
 0x12d   :  { %256 = vst [vmem:[#allocation6 + $0x1] sm:$0x1] %v377_v8 }
 0x12e   :  { %411 = shalt.err (!%p408_p12)
}
 0x12f   :  { %s412_s15 = scalar_lea.hbm %s507_s5, 32 }
 0x130   :  { %p413_p13 = scmp.ne.s32.totalorder %s507_s5, %s412_s15  ;;  %p416_p0 = scmp.lt.u32.totalorder %s412_s15, %s507_s5 }
 0x132   :  { %p418_p1 = pnand %p416_p0, %p413_p13 }
 0x134   :  { %421 = shalt.err (!%p418_p1)
}
 0x135   :  { %s434_s20 = smov 16   ;;  %s435_s21 = smov 1  }
 0x136   :  { %268 = dma.vmem_to_hbm [thread:$0]  %s263_s3, 32, %s507_s5, [#allocation5], %s434_s20, %s434_s20, %s435_s21  }
 0x137   :  { %424 = dma.done.wait [#allocation5], 32  }
 0x138   :  { %425 = vsyncadd [#allocation5], 4294967264 }
 0x139   :  { %272 = vsyncpa [#allocation4], 1 }
 0x13a   :  { %273 = vsyncpa [#allocation5], 1 }

</bundles_post_ra>
